<compile_context>
chip_gen: v5e
topology: v5e:2x2
jax: 0.10.0
libtpu: 0.0.40
codegen_flags: <defaults>
</compile_context>

<pallas_src>
import numpy as np
import jax
import jax.numpy as jnp
from jax.experimental import pallas as pl
from jax.experimental.pallas import tpu as pltpu

KSIZE = 3
EPS = 1e-5


def _make_scatter_matrices(H, W):
    """0/1 selection matrices encoding the stride-2 / pad-1 / output-pad-1 scatter."""
    Ho, Wo = 2 * H, 2 * W
    oy = np.arange(Ho)[:, None]
    iy = np.arange(H)[None, :]
    U = np.stack([(oy == 2 * iy - 1 + ky).astype(np.float32) for ky in range(KSIZE)])  # (3, Ho, H)
    jx = np.arange(W)[:, None]
    ox = np.arange(Wo)[None, :]
    V = np.stack([(ox == 2 * jx - 1 + kx).astype(np.float32) for kx in range(KSIZE)])  # (3, W, Wo)
    return U, V


def make_transition_block(B, Cin, Cout, H, W, dtype=jnp.float32, eps=EPS):
    Ho, Wo = 2 * H, 2 * W
    CinW, CoutWo = Cin * W, Cout * Wo

    U_np, V_np = _make_scatter_matrices(H, W)
    U = jnp.asarray(U_np)                       # (3, Ho, H)   row scatter
    V = jnp.asarray(V_np)                       # (3, W, Wo)   col scatter (folded with weights)

    # Per-channel mean operator on the (H, Cin*W) layout: row_sum @ Gmean yields, for every
    # column, the mean of the channel that column belongs to (channel = column // W).
    chan = np.arange(CinW) // W
    gmean_np = (chan[:, None] == chan[None, :]).astype(np.float32) / float(H * W)
    Gmean = jnp.asarray(gmean_np)               # (Cin*W, Cin*W)

    def kernel(gmean_ref, u_ref, wb_ref, bias_ref, x_ref, o_ref):
        # ---- InstanceNorm2d (affine=False, biased var, eps=1e-5) + ReLU, lane-dense ---------
        x = x_ref[0].astype(jnp.float32)                                     # (H, Cin*W)
        row_sum = jnp.sum(x, axis=0, keepdims=True)                          # (1, Cin*W)
        mean_row = jnp.dot(row_sum, gmean_ref[...],
                           preferred_element_type=jnp.float32)               # per-channel mean
        xc = x - mean_row
        sq_sum = jnp.sum(xc * xc, axis=0, keepdims=True)                     # (1, Cin*W)
        var_row = jnp.dot(sq_sum, gmean_ref[...],
                          preferred_element_type=jnp.float32)                # per-channel var
        a = jnp.maximum(xc * jax.lax.rsqrt(var_row + eps), 0.0)              # (H, Cin*W)

        # ---- ConvTranspose2d(k=3, s=2, p=1, op=1, bias): 6 lane-dense MXU dots --------------
        acc = jnp.broadcast_to(bias_ref[...], (Ho, CoutWo))                  # bias per column
        for ky in range(KSIZE):
            m = jnp.dot(a, wb_ref[ky], preferred_element_type=jnp.float32)       # (H, Cout*Wo)
            acc = acc + jnp.dot(u_ref[ky], m, preferred_element_type=jnp.float32)  # (Ho, Cout*Wo)
        o_ref[0] = acc.astype(o_ref.dtype)                                   # one full-lane store

    itemsize = jnp.dtype(dtype).itemsize
    flops = B * (2 * KSIZE * (H * CinW * CoutWo + Ho * H * CoutWo) + 8 * Cin * H * W)
    bytes_accessed = (B * (H * CinW + Ho * CoutWo) + KSIZE * CinW * CoutWo
                      + CinW * CinW + KSIZE * Ho * H + CoutWo) * itemsize

    call = pl.pallas_call(
        kernel,
        out_shape=jax.ShapeDtypeStruct((B, Ho, CoutWo), dtype),
        grid=(B,),
        in_specs=[
            pl.BlockSpec((CinW, CinW), lambda b: (0, 0)),               # Gmean
            pl.BlockSpec((KSIZE, Ho, H), lambda b: (0, 0, 0)),          # U scatter (rows)
            pl.BlockSpec((KSIZE, CinW, CoutWo), lambda b: (0, 0, 0)),   # weight-folded col scatter
            pl.BlockSpec((1, CoutWo), lambda b: (0, 0)),                # bias row
            pl.BlockSpec((1, H, CinW), lambda b: (b, 0, 0)),            # x as (B, H, Cin*W)
        ],
        out_specs=pl.BlockSpec((1, Ho, CoutWo), lambda b: (b, 0, 0)),
        compiler_params=pltpu.CompilerParams(dimension_semantics=("parallel",)),
        cost_estimate=pl.CostEstimate(flops=flops, transcendentals=B * CinW,
                                      bytes_accessed=bytes_accessed),
    )

    def transition_block(x, weight, bias):
        # x: (B, Cin, H, W) NCHW
        # weight: (Cin, Cout, 3, 3)  -- PyTorch ConvTranspose2d weight layout
        # bias: (Cout,)
        xt = jnp.transpose(x, (0, 2, 1, 3)).reshape(B, H, CinW)             # (B, H, Cin*W)
        # Fold weights into the column scatter: Wb[ky, ic*W+w, oc*Wo+wo] = sum_kx w*V_kx
        wb = jnp.einsum('ioyx,xwv->yiwov', weight.astype(jnp.float32), V)
        wb = wb.reshape(KSIZE, CinW, CoutWo)
        bias_row = jnp.repeat(bias.astype(jnp.float32), Wo)[None, :]        # (1, Cout*Wo)
        out_flat = call(Gmean, U, wb, bias_row, xt)                         # (B, Ho, Cout*Wo)
        return jnp.transpose(out_flat.reshape(B, Ho, Cout, Wo), (0, 2, 1, 3))  # back to NCHW

    return jax.jit(transition_block)


def transition_block_reference(x, weight, bias, eps=EPS):
    """Pure-JAX transcription of the PyTorch forward (independent formulation)."""
    mean = jnp.mean(x, axis=(2, 3), keepdims=True)
    var = jnp.mean(jnp.square(x - mean), axis=(2, 3), keepdims=True)
    a = jax.nn.relu((x - mean) / jnp.sqrt(var + eps))
    # ConvTranspose2d(k=3, s=2, p=1, op=1) == lhs-dilated correlation with the flipped kernel,
    # padding (k-1-p, k-1-p+op) = (1, 2) on each spatial dim, channels swapped.
    rhs = jnp.transpose(weight, (1, 0, 2, 3))[:, :, ::-1, ::-1]             # (Cout, Cin, 3, 3)
    y = jax.lax.conv_general_dilated(
        a, rhs,
        window_strides=(1, 1),
        padding=((1, 2), (1, 2)),
        lhs_dilation=(2, 2),
        rhs_dilation=(1, 1),
        dimension_numbers=("NCHW", "OIHW", "NCHW"),
        precision=jax.lax.Precision.HIGHEST)
    return y + bias[None, :, None, None]


if __name__ == "__main__":
    # Module config: in_planes=4, out_planes=8; dropRate is unused by the forward pass.
    B, Cin, Cout, H, W = 2, 4, 8, 16, 16

    key = jax.random.PRNGKey(0)
    key_x, key_w, key_b = jax.random.split(key, 3)
    x = jax.random.normal(key_x, (B, Cin, H, W), dtype=jnp.float32)
    weight = 0.1 * jax.random.normal(key_w, (Cin, Cout, KSIZE, KSIZE), dtype=jnp.float32)
    bias = 0.1 * jax.random.normal(key_b, (Cout,), dtype=jnp.float32)

    fwd = make_transition_block(B, Cin, Cout, H, W, dtype=x.dtype)
    out = jax.block_until_ready(fwd(x, weight, bias))

    ref = transition_block_reference(x, weight, bias)
    assert out.shape == (B, Cout, 2 * H, 2 * W), out.shape
    assert out.dtype == x.dtype
    max_err = float(jnp.max(jnp.abs(out - ref)))
    assert jnp.allclose(out, ref, atol=1e-4, rtol=1e-4), f"max abs err {max_err}"

    print("KERNEL_OK")
</pallas_src>

<mosaic_0001>
module attributes {stable_mosaic.version = 11 : i64} {
  func.func @kernel(%arg0: i32, %arg1: memref<64x64xf32, #tpu.memory_space<vmem>>, %arg2: memref<3x32x16xf32, #tpu.memory_space<vmem>>, %arg3: memref<3x64x256xf32, #tpu.memory_space<vmem>>, %arg4: memref<1x256xf32, #tpu.memory_space<vmem>>, %arg5: memref<1x16x64xf32, #tpu.memory_space<vmem>>, %arg6: memref<1x32x256xf32, #tpu.memory_space<vmem>>) attributes {dimension_semantics = [#tpu.dimension_semantics<parallel>], iteration_bounds = array<i64: 2>, scalar_prefetch = 0 : i64, scratch_operands = 0 : i64, tpu.core_type = #tpu.core_type<tc>, window_params = [{pipeline_mode = #tpu.pipeline_mode<synchronous>, transform_indices = @transform_0, window_bounds = array<i64: 64, 64>}, {pipeline_mode = #tpu.pipeline_mode<synchronous>, transform_indices = @transform_1, window_bounds = array<i64: 3, 32, 16>}, {pipeline_mode = #tpu.pipeline_mode<synchronous>, transform_indices = @transform_2, window_bounds = array<i64: 3, 64, 256>}, {pipeline_mode = #tpu.pipeline_mode<synchronous>, transform_indices = @transform_3, window_bounds = array<i64: 1, 256>}, {transform_indices = @transform_4, window_bounds = array<i64: 1, 16, 64>}, {transform_indices = @transform_5, window_bounds = array<i64: 1, 32, 256>}]} {
    %c0 = arith.constant 0 : index
    %c0_0 = arith.constant 0 : index
    %c0_1 = arith.constant 0 : index
    %0 = vector.load %arg5[%c0, %c0_0, %c0_1] : memref<1x16x64xf32, #tpu.memory_space<vmem>>, vector<1x16x64xf32>
    %1 = vector.shape_cast %0 : vector<1x16x64xf32> to vector<16x64xf32>
    %cst = arith.constant dense<0.000000e+00> : vector<64xf32>
    %2 = vector.multi_reduction <add>, %1, %cst [0] : vector<16x64xf32> to vector<64xf32>
    %3 = vector.shape_cast %2 : vector<64xf32> to vector<1x64xf32>
    %c0_2 = arith.constant 0 : index
    %c0_3 = arith.constant 0 : index
    %4 = vector.load %arg1[%c0_2, %c0_3] : memref<64x64xf32, #tpu.memory_space<vmem>>, vector<64x64xf32>
    %cst_4 = arith.constant dense<0.000000e+00> : vector<1x64xf32>
    %5 = tpu.matmul %3, %4, %cst_4 {dimension_numbers = #tpu.dot_dimension_numbers<[1], [0], [0], [1], [0, 0, 1, 1], [], []>} : vector<1x64xf32>, vector<64x64xf32>, vector<1x64xf32> -> vector<1x64xf32>
    %6 = vector.broadcast %5 : vector<1x64xf32> to vector<16x64xf32>
    %7 = arith.subf %1, %6 : vector<16x64xf32>
    %8 = arith.mulf %7, %7 : vector<16x64xf32>
    %cst_5 = arith.constant dense<0.000000e+00> : vector<64xf32>
    %9 = vector.multi_reduction <add>, %8, %cst_5 [0] : vector<16x64xf32> to vector<64xf32>
    %10 = vector.shape_cast %9 : vector<64xf32> to vector<1x64xf32>
    %c0_6 = arith.constant 0 : index
    %c0_7 = arith.constant 0 : index
    %11 = vector.load %arg1[%c0_6, %c0_7] : memref<64x64xf32, #tpu.memory_space<vmem>>, vector<64x64xf32>
    %cst_8 = arith.constant dense<0.000000e+00> : vector<1x64xf32>
    %12 = tpu.matmul %10, %11, %cst_8 {dimension_numbers = #tpu.dot_dimension_numbers<[1], [0], [0], [1], [0, 0, 1, 1], [], []>} : vector<1x64xf32>, vector<64x64xf32>, vector<1x64xf32> -> vector<1x64xf32>
    %cst_9 = arith.constant 9.99999974E-6 : f32
    %13 = vector.broadcast %cst_9 : f32 to vector<1x64xf32>
    %14 = arith.addf %12, %13 : vector<1x64xf32>
    %15 = math.rsqrt %14 : vector<1x64xf32>
    %16 = vector.broadcast %15 : vector<1x64xf32> to vector<16x64xf32>
    %17 = arith.mulf %7, %16 : vector<16x64xf32>
    %cst_10 = arith.constant 0.000000e+00 : f32
    %18 = vector.broadcast %cst_10 : f32 to vector<16x64xf32>
    %19 = arith.maximumf %17, %18 : vector<16x64xf32>
    %c0_11 = arith.constant 0 : index
    %c0_12 = arith.constant 0 : index
    %20 = vector.load %arg4[%c0_11, %c0_12] : memref<1x256xf32, #tpu.memory_space<vmem>>, vector<1x256xf32>
    %21 = vector.shape_cast %20 : vector<1x256xf32> to vector<1x256xf32>
    %22 = vector.broadcast %21 : vector<1x256xf32> to vector<32x256xf32>
    %c0_13 = arith.constant 0 : index
    %c0_14 = arith.constant 0 : index
    %c0_15 = arith.constant 0 : index
    %23 = vector.load %arg3[%c0_13, %c0_14, %c0_15] : memref<3x64x256xf32, #tpu.memory_space<vmem>>, vector<1x64x256xf32>
    %24 = vector.shape_cast %23 : vector<1x64x256xf32> to vector<64x256xf32>
    %cst_16 = arith.constant dense<0.000000e+00> : vector<16x256xf32>
    %25 = tpu.matmul %19, %24, %cst_16 {dimension_numbers = #tpu.dot_dimension_numbers<[1], [0], [0], [1], [0, 0, 1, 1], [], []>} : vector<16x64xf32>, vector<64x256xf32>, vector<16x256xf32> -> vector<16x256xf32>
    %c0_17 = arith.constant 0 : index
    %c0_18 = arith.constant 0 : index
    %c0_19 = arith.constant 0 : index
    %26 = vector.load %arg2[%c0_17, %c0_18, %c0_19] : memref<3x32x16xf32, #tpu.memory_space<vmem>>, vector<1x32x16xf32>
    %27 = vector.shape_cast %26 : vector<1x32x16xf32> to vector<32x16xf32>
    %cst_20 = arith.constant dense<0.000000e+00> : vector<32x256xf32>
    %28 = tpu.matmul %27, %25, %cst_20 {dimension_numbers = #tpu.dot_dimension_numbers<[1], [0], [0], [1], [0, 0, 1, 1], [], []>} : vector<32x16xf32>, vector<16x256xf32>, vector<32x256xf32> -> vector<32x256xf32>
    %29 = arith.addf %22, %28 : vector<32x256xf32>
    %c1 = arith.constant 1 : index
    %c0_21 = arith.constant 0 : index
    %c0_22 = arith.constant 0 : index
    %30 = vector.load %arg3[%c1, %c0_21, %c0_22] : memref<3x64x256xf32, #tpu.memory_space<vmem>>, vector<1x64x256xf32>
    %31 = vector.shape_cast %30 : vector<1x64x256xf32> to vector<64x256xf32>
    %cst_23 = arith.constant dense<0.000000e+00> : vector<16x256xf32>
    %32 = tpu.matmul %19, %31, %cst_23 {dimension_numbers = #tpu.dot_dimension_numbers<[1], [0], [0], [1], [0, 0, 1, 1], [], []>} : vector<16x64xf32>, vector<64x256xf32>, vector<16x256xf32> -> vector<16x256xf32>
    %c1_24 = arith.constant 1 : index
    %c0_25 = arith.constant 0 : index
    %c0_26 = arith.constant 0 : index
    %33 = vector.load %arg2[%c1_24, %c0_25, %c0_26] : memref<3x32x16xf32, #tpu.memory_space<vmem>>, vector<1x32x16xf32>
    %34 = vector.shape_cast %33 : vector<1x32x16xf32> to vector<32x16xf32>
    %cst_27 = arith.constant dense<0.000000e+00> : vector<32x256xf32>
    %35 = tpu.matmul %34, %32, %cst_27 {dimension_numbers = #tpu.dot_dimension_numbers<[1], [0], [0], [1], [0, 0, 1, 1], [], []>} : vector<32x16xf32>, vector<16x256xf32>, vector<32x256xf32> -> vector<32x256xf32>
    %36 = arith.addf %29, %35 : vector<32x256xf32>
    %c2 = arith.constant 2 : index
    %c0_28 = arith.constant 0 : index
    %c0_29 = arith.constant 0 : index
    %37 = vector.load %arg3[%c2, %c0_28, %c0_29] : memref<3x64x256xf32, #tpu.memory_space<vmem>>, vector<1x64x256xf32>
    %38 = vector.shape_cast %37 : vector<1x64x256xf32> to vector<64x256xf32>
    %cst_30 = arith.constant dense<0.000000e+00> : vector<16x256xf32>
    %39 = tpu.matmul %19, %38, %cst_30 {dimension_numbers = #tpu.dot_dimension_numbers<[1], [0], [0], [1], [0, 0, 1, 1], [], []>} : vector<16x64xf32>, vector<64x256xf32>, vector<16x256xf32> -> vector<16x256xf32>
    %c2_31 = arith.constant 2 : index
    %c0_32 = arith.constant 0 : index
    %c0_33 = arith.constant 0 : index
    %40 = vector.load %arg2[%c2_31, %c0_32, %c0_33] : memref<3x32x16xf32, #tpu.memory_space<vmem>>, vector<1x32x16xf32>
    %41 = vector.shape_cast %40 : vector<1x32x16xf32> to vector<32x16xf32>
    %cst_34 = arith.constant dense<0.000000e+00> : vector<32x256xf32>
    %42 = tpu.matmul %41, %39, %cst_34 {dimension_numbers = #tpu.dot_dimension_numbers<[1], [0], [0], [1], [0, 0, 1, 1], [], []>} : vector<32x16xf32>, vector<16x256xf32>, vector<32x256xf32> -> vector<32x256xf32>
    %43 = arith.addf %36, %42 : vector<32x256xf32>
    %c0_35 = arith.constant 0 : index
    %c0_36 = arith.constant 0 : index
    %c0_37 = arith.constant 0 : index
    %44 = vector.load %arg6[%c0_35, %c0_36, %c0_37] : memref<1x32x256xf32, #tpu.memory_space<vmem>>, vector<1x32x256xf32>
    %45 = vector.shape_cast %44 : vector<1x32x256xf32> to vector<32x256xf32>
    %46 = vector.shape_cast %43 : vector<32x256xf32> to vector<1x32x256xf32>
    tpu.vector_store %arg6[%c0_35, %c0_36, %c0_37], %46 {strides = array<i32>} : memref<1x32x256xf32, #tpu.memory_space<vmem>>, vector<1x32x256xf32>,
    return
  }
  func.func @transform_0(%arg0: i32) -> (i32, i32) {
    %c0_i32 = arith.constant 0 : i32
    %c0_i32_0 = arith.constant 0 : i32
    %c0_i32_1 = arith.constant 0 : i32
    return %c0_i32, %c0_i32_0 : i32, i32
  }
  func.func @transform_1(%arg0: i32) -> (i32, i32, i32) {
    %c0_i32 = arith.constant 0 : i32
    %c0_i32_0 = arith.constant 0 : i32
    %c0_i32_1 = arith.constant 0 : i32
    %c0_i32_2 = arith.constant 0 : i32
    return %c0_i32, %c0_i32_0, %c0_i32_1 : i32, i32, i32
  }
  func.func @transform_2(%arg0: i32) -> (i32, i32, i32) {
    %c0_i32 = arith.constant 0 : i32
    %c0_i32_0 = arith.constant 0 : i32
    %c0_i32_1 = arith.constant 0 : i32
    %c0_i32_2 = arith.constant 0 : i32
    return %c0_i32, %c0_i32_0, %c0_i32_1 : i32, i32, i32
  }
  func.func @transform_3(%arg0: i32) -> (i32, i32) {
    %c0_i32 = arith.constant 0 : i32
    %c0_i32_0 = arith.constant 0 : i32
    %c0_i32_1 = arith.constant 0 : i32
    return %c0_i32, %c0_i32_0 : i32, i32
  }
  func.func @transform_4(%arg0: i32) -> (i32, i32, i32) {
    %c0_i32 = arith.constant 0 : i32
    %c0_i32_0 = arith.constant 0 : i32
    %c0_i32_1 = arith.constant 0 : i32
    return %arg0, %c0_i32, %c0_i32_0 : i32, i32, i32
  }
  func.func @transform_5(%arg0: i32) -> (i32, i32, i32) {
    %c0_i32 = arith.constant 0 : i32
    %c0_i32_0 = arith.constant 0 : i32
    %c0_i32_1 = arith.constant 0 : i32
    return %arg0, %c0_i32, %c0_i32_0 : i32, i32, i32
  }
}

</mosaic_0001>

<bundles_post_ra>
// kernel: transition_block.1
= control target key start
LH: loop header
LB: loop body
LE: loop exit
PB: predicated region body
PF: predicated region fallthrough
CT: control target
= control target key end

     0   :  { %s971_s18 = smov 0   ;;  %s1283_s0 = inlined_call_operand.vmem [shape: f32[64,64], index: 0, kind: input, shape index: {}]   ;;  %s1284_s1 = inlined_call_operand.vmem [shape: f32[3,32,16], index: 1, kind: input, shape index: {}]   ;;  %s1285_s2 = inlined_call_operand.vmem [shape: f32[3,64,256], index: 2, kind: input, shape index: {}]   ;;  %s1286_s3 = inlined_call_operand.vmem [shape: f32[1,256], index: 3, kind: input, shape index: {}]   ;;  %s1287_s4 = inlined_call_operand.vmem [shape: f32[2,16,64], index: 4, kind: input, shape index: {}]   ;;  %s1288_s5 = inlined_call_operand.vmem [shape: f32[2,32,256], index: 5, kind: output, shape index: {}]  }
   0x1 LB: > { %s832_s19 = sadd.s32 4294967295, %s939_s18   ;;  %p836_p0 = scmp.ge.s32.totalorder %s939_s18, 1  ;;  %s939_s18 = sphi %s971_s18, %s15_s18  }
   0x2   : > { %p187_p1 = scmp.lt.s32.totalorder %s939_s18, 3 }
   0x4   : > { %p188_p2 = pnand %p836_p0, %p187_p1 }
   0x5   : > { %p215_p3 = scmp.lt.s32.totalorder (!%p188_p2), %s832_s19, 1 }
   0x6   : > { %191 = sbr.rel (%p188_p2) target bundleno = 807 (0x327), region = 40 }
   0xb   : > { %v244_v0 = vld [vmem:[%s1283_s0 + $0x38] sm:$0xff]  ;;  %v243_v1 = vld [vmem:[%s1283_s0 + $0x30] sm:$0xff]  ;;  %v242_v2 = vld [vmem:[%s1283_s0 + $0x28] sm:$0xff]  ;;  %s1290_s19 = smov (!%p215_p3, %s832_s19), 1  ;;  %vm227_vm0 = vcmask 523264   ;;  %vm398_vm4 = vcmask 130048  }
   0xc   : > { %256 = vmatpush.msra.mxu2 %v244_v0  ;;  %293 = vmatpush.msra.mxu3 %v244_v0  ;;  %v241_v3 = vld [vmem:[%s1283_s0 + $0x20] sm:$0xff]  ;;  %s921_s28 = sshll.u32 %s1290_s19, 4  ;;  %v240_v4 = vld [vmem:[%s1283_s0 + $0x18] sm:$0xff]  ;;  %v239_v9 = vld [vmem:[%s1283_s0 + $0x10] sm:$0xff]  ;;  %s922_s24 = sshll.u32 %s1290_s19, 6 }
   0xd   : > { %s219_s6 = scalar_lea.vmem %s1287_s4, %s921_s28  ;;  %v238_v11 = vld [vmem:[%s1283_s0 + $0x8] sm:$0xff]  ;;  %v237_v13 = vld [vmem:[%s1283_s0] sm:$0xff]  ;;  %v340_v34 = vld [vmem:[%s1285_s2 + $0x70] sm:$0xff]  ;;  %s1268_s27 = scalar_lea.vmem %s1288_s5, %s922_s24 }
   0xe   : > { %257 = vmatpush.msra.mxu2 %v243_v1  ;;  %294 = vmatpush.msra.mxu3 %v243_v1  ;;  %v225_v5 = vld [vmem:[%s219_s6] sm:$0xff]  ;;  %v226_v6 = vld [vmem:[%s219_s6 + $0x8] sm:$0xff]  ;;  %v341_v35 = vld [vmem:[%s1285_s2 + $0x78] sm:$0xff] }
   0xf   : > { %v228_v7 = vsel %vm227_vm0, %v225_v5, 0.0  ;;  %v229_v8 = vsel %vm227_vm0, %v226_v6, 0.0  ;;  %v338_v36 = vld [vmem:[%s1285_s2 + $0x60] sm:$0xff]  ;;  %v339_v37 = vld [vmem:[%s1285_s2 + $0x68] sm:$0xff]  ;;  %v336_v38 = vld [vmem:[%s1285_s2 + $0x50] sm:$0xff] }
  0x10   : > { %258 = vmatpush.msra.mxu2 %v242_v2  ;;  %295 = vmatpush.msra.mxu3 %v242_v2  ;;  %v230_v10 = vadd.f32 %v229_v8, %v228_v7  ;;  %v337_v39 = vld [vmem:[%s1285_s2 + $0x58] sm:$0xff]  ;;  %v334_v40 = vld [vmem:[%s1285_s2 + $0x40] sm:$0xff]  ;;  %v335_v41 = vld [vmem:[%s1285_s2 + $0x48] sm:$0xff] }
  0x11   : > { %v332_v42 = vld [vmem:[%s1285_s2 + $0x30] sm:$0xff]  ;;  %v333_v43 = vld [vmem:[%s1285_s2 + $0x38] sm:$0xff]  ;;  %v330_v44 = vld [vmem:[%s1285_s2 + $0x20] sm:$0xff] }
  0x12   : > { %259 = vmatpush.msra.mxu2 %v241_v3  ;;  %296 = vmatpush.msra.mxu3 %v241_v3  ;;  %v231_v12 = vrot.slane %v230_v10, 4  ;;  %v331_v45 = vld [vmem:[%s1285_s2 + $0x28] sm:$0xff]  ;;  %v328_v46 = vld [vmem:[%s1285_s2 + $0x10] sm:$0xff]  ;;  %v329_v47 = vld [vmem:[%s1285_s2 + $0x18] sm:$0xff] }
  0x13   : > { %v326_v48 = vld [vmem:[%s1285_s2] sm:$0xff]  ;;  %v327_v49 = vld [vmem:[%s1285_s2 + $0x8] sm:$0xff]  ;;  %v869_v50 = vld [vmem:[%s1285_s2 + $0xf0] sm:$0xff] }
  0x14   : > { %260 = vmatpush.msra.mxu2 %v240_v4  ;;  %297 = vmatpush.msra.mxu3 %v240_v4  ;;  %v232_v14 = vadd.f32 %v231_v12, %v230_v10  ;;  %v870_v51 = vld [vmem:[%s1285_s2 + $0xf8] sm:$0xff]  ;;  %v867_v52 = vld [vmem:[%s1285_s2 + $0xe0] sm:$0xff]  ;;  %v868_v53 = vld [vmem:[%s1285_s2 + $0xe8] sm:$0xff] }
  0x15   : > { %v865_v54 = vld [vmem:[%s1285_s2 + $0xd0] sm:$0xff]  ;;  %v866_v55 = vld [vmem:[%s1285_s2 + $0xd8] sm:$0xff]  ;;  %v863_v56 = vld [vmem:[%s1285_s2 + $0xc0] sm:$0xff] }
  0x16   : > { %261 = vmatpush.msra.mxu2 %v239_v9  ;;  %298 = vmatpush.msra.mxu3 %v239_v9  ;;  %v233_v15 = vrot.slane %v232_v14, 2  ;;  %v864_v57 = vld [vmem:[%s1285_s2 + $0xc8] sm:$0xff]  ;;  %v861_v60 = vld [vmem:[%s1285_s2 + $0xb0] sm:$0xff]  ;;  %v862_v61 = vld [vmem:[%s1285_s2 + $0xb8] sm:$0xff] }
  0x17   : > { %v859_v62 = vld [vmem:[%s1285_s2 + $0xa0] sm:$0xff]  ;;  %v860_v63 = vld [vmem:[%s1285_s2 + $0xa8] sm:$0xff]  ;;  %v857_v0 = vld [vmem:[%s1285_s2 + $0x90] sm:$0xff] }
  0x18   : > { %262 = vmatpush.msra.mxu2 %v238_v11  ;;  %299 = vmatpush.msra.mxu3 %v238_v11  ;;  %v234_v16 = vadd.f32 %v233_v15, %v232_v14  ;;  %v858_v1 = vld [vmem:[%s1285_s2 + $0x98] sm:$0xff]  ;;  %v855_v2 = vld [vmem:[%s1285_s2 + $0x80] sm:$0xff]  ;;  %v856_v3 = vld [vmem:[%s1285_s2 + $0x88] sm:$0xff] }
  0x1a   : > { %263 = vmatpush.msra.mxu2 %v237_v13  ;;  %300 = vmatpush.msra.mxu3 %v237_v13  ;;  %v235_v17 = vrot.slane %v234_v16, 1 }
  0x1c   : > { %v236_v18 = vadd.f32 %v235_v17, %v234_v16  ;;  %356 = vmatpush.msrb.mxu2 %v340_v34  ;;  %379 = vmatpush.msrb.mxu3 %v341_v35  ;;  %v891_v34 = vld [vmem:[%s1285_s2 + $0x120] sm:$0xff]  ;;  %v892_v35 = vld [vmem:[%s1285_s2 + $0x128] sm:$0xff] }
  0x1e   : > { %841 = vmatmul.msk.f32.vlgmr.msra.gmra.mxu2 %vm227_vm0, %v236_v18  ;;  %380 = vmatpush.msrb.mxu3 %v339_v37  ;;  %v890_v37 = vld [vmem:[%s1285_s2 + $0x118] sm:$0xff] }
  0x1f   : > { %357 = vmatpush.msrb.mxu2 %v338_v36  ;;  %v889_v36 = vld [vmem:[%s1285_s2 + $0x110] sm:$0xff] }
  0x20   : > { %381 = vmatpush.msrb.mxu3 %v337_v39 }
  0x21   : > { %358 = vmatpush.msrb.mxu2 %v336_v38 }
  0x22   : > { %382 = vmatpush.msrb.mxu3 %v335_v41  ;;  %v875_v41 = vld [vmem:[%s1284_s1 + $0x20] sm:$0xff] }
  0x23   : > { %359 = vmatpush.msrb.mxu2 %v334_v40  ;;  %v396_v40 = vld [vmem:[%s1284_s1 + $0x10] sm:$0xff] }
  0x24   : > { %383 = vmatpush.msrb.mxu3 %v333_v43  ;;  %v888_v43 = vld [vmem:[%s1285_s2 + $0x108] sm:$0xff] }
  0x25   : > { %360 = vmatpush.msrb.mxu2 %v332_v42  ;;  %v887_v42 = vld [vmem:[%s1285_s2 + $0x100] sm:$0xff] }
  0x26   : > { %384 = vmatpush.msrb.mxu3 %v331_v45  ;;  %v876_v45 = vld [vmem:[%s1284_s1 + $0x28] sm:$0xff] }
  0x27   : > { %361 = vmatpush.msrb.mxu2 %v330_v44  ;;  %v397_v44 = vld [vmem:[%s1284_s1 + $0x18] sm:$0xff] }
  0x28   : > { %385 = vmatpush.msrb.mxu3 %v329_v47  ;;  %v878_v47 = vld [vmem:[%s1284_s1 + $0x38] sm:$0xff] }
  0x29   : > { %362 = vmatpush.msrb.mxu2 %v328_v46  ;;  %v877_v46 = vld [vmem:[%s1284_s1 + $0x30] sm:$0xff] }
  0x2a   : > { %386 = vmatpush.msrb.mxu3 %v327_v49 }
  0x2b   : > { %363 = vmatpush.msrb.mxu2 %v326_v48 }
  0x2d   : > { %502 = vmatpush.msra.mxu2 %v869_v50 }
  0x2f   : > { %503 = vmatpush.msra.mxu2 %v867_v52 }
  0x31   : > { %504 = vmatpush.msra.mxu2 %v865_v54 }
  0x33   : > { %505 = vmatpush.msra.mxu2 %v863_v56 }
  0x35   : > { %506 = vmatpush.msra.mxu2 %v861_v60  ;;  %v907_v60 = vld [vmem:[%s1284_s1 + $0x40] sm:$0xff] }
  0x37   : > { %507 = vmatpush.msra.mxu2 %v859_v62  ;;  %v909_v62 = vld [vmem:[%s1284_s1 + $0x50] sm:$0xff] }
  0x39   : > { %508 = vmatpush.msra.mxu2 %v857_v0 }
  0x3b   : > { %509 = vmatpush.msra.mxu2 %v855_v2  ;;  %v320_v2 = vld [vmem:[%s1286_s3] sm:$0x3] }
  0xa1   : > { %v265_v19 = vpop.f32.mrf.mxu2 }
  0xa2   : > { %v268_v20 = vperm.slane %v265_v19, 0 }
  0xa4   : > { %v1012_v21 = vsub.f32 %v225_v5, %v268_v20  ;;  %v1014_v22 = vsub.f32 %v226_v6, %v268_v20  ;;  %v394_v20 = vld [vmem:[%s1284_s1] sm:$0xff] }
  0xa6   : > { %v271_v23 = vmul.f32 %v1012_v21, %v1012_v21  ;;  %v272_v24 = vmul.f32 %v1014_v22, %v1014_v22 }
  0xa8   : > { %v273_v25 = vsel %vm227_vm0, %v271_v23, 0.0  ;;  %v274_v26 = vsel %vm227_vm0, %v272_v24, 0.0  ;;  %v899_v23 = vld [vmem:[%s1285_s2 + $0x160] sm:$0xff]  ;;  %v900_v24 = vld [vmem:[%s1285_s2 + $0x168] sm:$0xff] }
  0xa9   : > { %v275_v27 = vadd.f32 %v274_v26, %v273_v25  ;;  %v897_v25 = vld [vmem:[%s1285_s2 + $0x150] sm:$0xff]  ;;  %v898_v26 = vld [vmem:[%s1285_s2 + $0x158] sm:$0xff] }
  0xab   : > { %v276_v28 = vrot.slane %v275_v27, 4 }
  0xad   : > { %v277_v29 = vadd.f32 %v276_v28, %v275_v27 }
  0xaf   : > { %v278_v30 = vrot.slane %v277_v29, 2 }
  0xb1   : > { %v279_v31 = vadd.f32 %v278_v30, %v277_v29  ;;  %v895_v29 = vld [vmem:[%s1285_s2 + $0x140] sm:$0xff]  ;;  %v896_v30 = vld [vmem:[%s1285_s2 + $0x148] sm:$0xff] }
  0xb3   : > { %v280_v32 = vrot.slane %v279_v31, 1 }
  0xb5   : > { %v281_v33 = vadd.f32 %v280_v32, %v279_v31  ;;  %v395_v31 = vld [vmem:[%s1284_s1 + $0x8] sm:$0xff]  ;;  %v893_v32 = vld [vmem:[%s1285_s2 + $0x130] sm:$0xff] }
  0xb7   : > { %842 = vmatmul.msk.f32.vlgmr.msra.gmra.mxu3 %vm227_vm0, %v281_v33  ;;  %v894_v33 = vld [vmem:[%s1285_s2 + $0x138] sm:$0xff] }
  0xb8   : > { %525 = vmatpush.msra.mxu3 %v870_v51 }
  0xba   : > { %526 = vmatpush.msra.mxu3 %v868_v53 }
  0xbc   : > { %527 = vmatpush.msra.mxu3 %v866_v55 }
  0xbe   : > { %528 = vmatpush.msra.mxu3 %v864_v57 }
  0xc0   : > { %529 = vmatpush.msra.mxu3 %v862_v61  ;;  %v908_v61 = vld [vmem:[%s1284_s1 + $0x48] sm:$0xff] }
  0xc2   : > { %530 = vmatpush.msra.mxu3 %v860_v63  ;;  %v910_v63 = vld [vmem:[%s1284_s1 + $0x58] sm:$0xff] }
  0xc4   : > { %531 = vmatpush.msra.mxu3 %v858_v1 }
  0xc6   : > { %532 = vmatpush.msra.mxu3 %v856_v3  ;;  %v322_v3 = vperm.slane %v320_v2, 0 }
 0x13a   : > { %v302_v58 = vpop.f32.mrf.mxu3 }
 0x13b   : > { %v303_v59 = vadd.f32 1e-05, %v302_v58 }
 0x13d   : > { %931 = vrsqrt.f32 %v303_v59  ;;  %vm311_vm2 = vweird.f32 %v303_v59 }
 0x143   : > { %v932_v4 = vpop.eup %931 }
 0x144   : > { %v306_v5 = vmul.f32 %v932_v4, %v303_v59  ;;  %vm312_vm1 = vweird.f32 %v932_v4 }
 0x145   : > { %vm313_vm3 = vmor %vm311_vm2, %vm312_vm1 }
 0x146   : > { %v307_v6 = vmul.f32 %v932_v4, %v306_v5 }
 0x148   : > { %v308_v7 = vmul.f32 0.5, %v307_v6 }
 0x14a   : > { %v309_v8 = vsub.f32 1.5, %v308_v7 }
 0x14c   : > { %v310_v9 = vmul.f32 %v932_v4, %v309_v8 }
 0x14e   : > { %v314_v10 = vsel %vm313_vm3, %v932_v4, %v310_v9  ;;  %v323_v4 = vperm.slane %v320_v2, 1 }
 0x14f   : > { %v315_v11 = vperm.slane %v314_v10, 0 }
 0x151   : > { %v316_v12 = vmul.f32 %v315_v11, %v1012_v21  ;;  %v317_v14 = vmul.f32 %v315_v11, %v1014_v22  ;;  %v901_v21 = vld [vmem:[%s1285_s2 + $0x170] sm:$0xff]  ;;  %v902_v22 = vld [vmem:[%s1285_s2 + $0x178] sm:$0xff] }
 0x153   : > { %v1120_v13 = vmax.f32 %v316_v12, 0.0  ;;  %v1127_v15 = vmax.f32 %v317_v14, 0.0 }
 0x155   : > { %843 = vmatmul.msk.f32.vlgmr.msrb.gmra.mxu2 %vm227_vm0, %v1120_v13  ;;  %845 = vmatmul.msk.f32.vlgmr.msrb.gmra.mxu3 %vm227_vm0, %v1120_v13 }
 0x15d   : > { %844 = vmatmul.msk.f32.gmra.mxu2 %vm227_vm0, %v1127_v15  ;;  %846 = vmatmul.msk.f32.gmra.mxu3 %vm227_vm0, %v1127_v15 }
 0x165   : > { %871 = vmatmul.msk.f32.vlgmr.msra.gmra.mxu2 %vm227_vm0, %v1120_v13  ;;  %873 = vmatmul.msk.f32.vlgmr.msra.gmra.mxu3 %vm227_vm0, %v1120_v13 }
 0x16d   : > { %872 = vmatmul.msk.f32.gmra.mxu2 %vm227_vm0, %v1127_v15  ;;  %874 = vmatmul.msk.f32.gmra.mxu3 %vm227_vm0, %v1127_v15 }
 0x1d8   : > { %v365_v16 = vpop.f32.mrf.mxu2  ;;  %v388_v17 = vpop.f32.mrf.mxu3 }
 0x1e0   : > { %v368_v18 = vpop.f32.mrf.mxu2  ;;  %v391_v19 = vpop.f32.mrf.mxu3 }
 0x1e1   : > { %425 = vmatpush.msra.mxu0 %v368_v18  ;;  %454 = vmatpush.msra.mxu1 %v391_v19 }
 0x1e3   : > { %426 = vmatpush.msra.mxu0 %v365_v16  ;;  %455 = vmatpush.msra.mxu1 %v388_v17 }
 0x1e4   : > { %847 = vmatmul.msk.f32.vlgmr.msra.gmra.mxu0 %vm398_vm4, %v394_v20  ;;  %851 = vmatmul.msk.f32.vlgmr.msra.gmra.mxu1 %vm398_vm4, %v394_v20 }
 0x1e5   : > { %648 = vmatpush.msrb.mxu0 %v901_v21  ;;  %671 = vmatpush.msrb.mxu1 %v902_v22 }
 0x1e7   : > { %649 = vmatpush.msrb.mxu0 %v899_v23  ;;  %672 = vmatpush.msrb.mxu1 %v900_v24 }
 0x1e8   : > { %v511_v27 = vpop.f32.mrf.mxu2  ;;  %v534_v28 = vpop.f32.mrf.mxu3 }
 0x1e9   : > { %650 = vmatpush.msrb.mxu0 %v897_v25  ;;  %673 = vmatpush.msrb.mxu1 %v898_v26 }
 0x1eb   : > { %651 = vmatpush.msrb.mxu0 %v895_v29  ;;  %674 = vmatpush.msrb.mxu1 %v896_v30 }
 0x1ec   : > { %848 = vmatmul.msk.f32.gmra.mxu0 %vm398_vm4, %v395_v31  ;;  %852 = vmatmul.msk.f32.gmra.mxu1 %vm398_vm4, %v395_v31 }
 0x1ed   : > { %652 = vmatpush.msrb.mxu0 %v893_v32  ;;  %675 = vmatpush.msrb.mxu1 %v894_v33 }
 0x1ef   : > { %653 = vmatpush.msrb.mxu0 %v891_v34  ;;  %676 = vmatpush.msrb.mxu1 %v892_v35 }
 0x1f0   : > { %v514_v38 = vpop.f32.mrf.mxu2  ;;  %v537_v39 = vpop.f32.mrf.mxu3 }
 0x1f1   : > { %571 = vmatpush.msrb.mxu2 %v514_v38  ;;  %600 = vmatpush.msrb.mxu3 %v537_v39 }
 0x1f2   : > { %654 = vmatpush.msrb.mxu0 %v889_v36  ;;  %677 = vmatpush.msrb.mxu1 %v890_v37 }
 0x1f3   : > { %572 = vmatpush.msrb.mxu2 %v511_v27  ;;  %601 = vmatpush.msrb.mxu3 %v534_v28 }
 0x1f4   : > { %849 = vmatmul.msk.f32.gmra.mxu0 %vm398_vm4, %v396_v40  ;;  %853 = vmatmul.msk.f32.gmra.mxu1 %vm398_vm4, %v396_v40 }
 0x1f5   : > { %879 = vmatmul.msk.f32.vlgmr.msrb.gmra.mxu2 %vm398_vm4, %v875_v41  ;;  %883 = vmatmul.msk.f32.vlgmr.msrb.gmra.mxu3 %vm398_vm4, %v875_v41 }
 0x1f6   : > { %655 = vmatpush.msrb.mxu0 %v887_v42  ;;  %678 = vmatpush.msrb.mxu1 %v888_v43 }
 0x1fc   : > { %850 = vmatmul.msk.f32.gmra.mxu0 %vm398_vm4, %v397_v44  ;;  %854 = vmatmul.msk.f32.gmra.mxu1 %vm398_vm4, %v397_v44 }
 0x1fd   : > { %880 = vmatmul.msk.f32.gmra.mxu2 %vm398_vm4, %v876_v45  ;;  %884 = vmatmul.msk.f32.gmra.mxu3 %vm398_vm4, %v876_v45 }
 0x204   : > { %903 = vmatmul.msk.f32.vlgmr.msrb.gmra.mxu0 %vm227_vm0, %v1120_v13  ;;  %905 = vmatmul.msk.f32.vlgmr.msrb.gmra.mxu1 %vm227_vm0, %v1120_v13 }
 0x205   : > { %881 = vmatmul.msk.f32.gmra.mxu2 %vm398_vm4, %v877_v46  ;;  %885 = vmatmul.msk.f32.gmra.mxu3 %vm398_vm4, %v877_v46 }
 0x20c   : > { %904 = vmatmul.msk.f32.gmra.mxu0 %vm227_vm0, %v1127_v15  ;;  %906 = vmatmul.msk.f32.gmra.mxu1 %vm227_vm0, %v1127_v15 }
 0x20d   : > { %882 = vmatmul.msk.f32.gmra.mxu2 %vm398_vm4, %v878_v47  ;;  %886 = vmatmul.msk.f32.gmra.mxu3 %vm398_vm4, %v878_v47 }
 0x261   : > { %v428_v48 = vpop.f32.mrf.mxu0  ;;  %v457_v49 = vpop.f32.mrf.mxu1 }
 0x262   : > { %v469_v5 = vadd.f32 %v428_v48, %v322_v3  ;;  %v470_v6 = vadd.f32 %v457_v49, %v323_v4 }
 0x269   : > { %v431_v50 = vpop.f32.mrf.mxu0  ;;  %v460_v51 = vpop.f32.mrf.mxu1 }
 0x26a   : > { %v471_v15 = vadd.f32 %v431_v50, %v322_v3  ;;  %v472_v16 = vadd.f32 %v460_v51, %v323_v4 }
 0x271   : > { %v434_v52 = vpop.f32.mrf.mxu0  ;;  %v463_v53 = vpop.f32.mrf.mxu1 }
 0x272   : > { %v473_v25 = vadd.f32 %v434_v52, %v322_v3  ;;  %v474_v26 = vadd.f32 %v463_v53, %v323_v4 }
 0x278   : > { %v574_v0 = vpop.f32.mrf.mxu2  ;;  %v603_v1 = vpop.f32.mrf.mxu3 }
 0x279   : > { %v1237_v54 = vpop.f32.mrf.mxu0  ;;  %v1239_v55 = vpop.f32.mrf.mxu1  ;;  %v615_v7 = vadd.f32 %v574_v0, %v469_v5  ;;  %v616_v8 = vadd.f32 %v603_v1, %v470_v6 }
 0x27a   : > { %v475_v35 = vadd.f32 %v1237_v54, %v322_v3  ;;  %v476_v36 = vadd.f32 %v1239_v55, %v323_v4 }
 0x280   : > { %v577_v9 = vpop.f32.mrf.mxu2  ;;  %v606_v10 = vpop.f32.mrf.mxu3 }
 0x281   : > { %v657_v56 = vpop.f32.mrf.mxu0  ;;  %v680_v57 = vpop.f32.mrf.mxu1  ;;  %v617_v17 = vadd.f32 %v577_v9, %v471_v15  ;;  %v618_v18 = vadd.f32 %v606_v10, %v472_v16 }
 0x288   : > { %v580_v23 = vpop.f32.mrf.mxu2  ;;  %v609_v24 = vpop.f32.mrf.mxu3 }
 0x289   : > { %v660_v58 = vpop.f32.mrf.mxu0  ;;  %v683_v59 = vpop.f32.mrf.mxu1  ;;  %v619_v27 = vadd.f32 %v580_v23, %v473_v25  ;;  %v620_v28 = vadd.f32 %v609_v24, %v474_v26 }
 0x28a   : > { %717 = vmatpush.msra.mxu0 %v660_v58  ;;  %746 = vmatpush.msra.mxu1 %v683_v59 }
 0x28c   : > { %718 = vmatpush.msra.mxu0 %v657_v56  ;;  %747 = vmatpush.msra.mxu1 %v680_v57 }
 0x28d   : > { %911 = vmatmul.msk.f32.vlgmr.msra.gmra.mxu0 %vm398_vm4, %v907_v60  ;;  %915 = vmatmul.msk.f32.vlgmr.msra.gmra.mxu1 %vm398_vm4, %v907_v60 }
 0x290   : > { %v583_v33 = vpop.f32.mrf.mxu2  ;;  %v612_v34 = vpop.f32.mrf.mxu3 }
 0x291   : > { %v621_v37 = vadd.f32 %v583_v33, %v475_v35  ;;  %v622_v38 = vadd.f32 %v612_v34, %v476_v36 }
 0x295   : > { %912 = vmatmul.msk.f32.gmra.mxu0 %vm398_vm4, %v908_v61  ;;  %916 = vmatmul.msk.f32.gmra.mxu1 %vm398_vm4, %v908_v61 }
 0x29d   : > { %913 = vmatmul.msk.f32.gmra.mxu0 %vm398_vm4, %v909_v62  ;;  %917 = vmatmul.msk.f32.gmra.mxu1 %vm398_vm4, %v909_v62 }
 0x2a5   : > { %914 = vmatmul.msk.f32.gmra.mxu0 %vm398_vm4, %v910_v63  ;;  %918 = vmatmul.msk.f32.gmra.mxu1 %vm398_vm4, %v910_v63 }
 0x30a   : > { %v720_v11 = vpop.f32.mrf.mxu0  ;;  %v749_v12 = vpop.f32.mrf.mxu1 }
 0x30b   : > { %v761_v13 = vadd.f32 %v720_v11, %v615_v7  ;;  %v762_v14 = vadd.f32 %v749_v12, %v616_v8 }
 0x30d   : > { %769 = vst [vmem:[%s1268_s27] sm:$0xff] %v761_v13 }
 0x30e   : > { %770 = vst [vmem:[%s1268_s27 + $0x8] sm:$0xff] %v762_v14 }
 0x312   : > { %v723_v19 = vpop.f32.mrf.mxu0  ;;  %v752_v20 = vpop.f32.mrf.mxu1 }
 0x313   : > { %v763_v21 = vadd.f32 %v723_v19, %v617_v17  ;;  %v764_v22 = vadd.f32 %v752_v20, %v618_v18 }
 0x315   : > { %771 = vst [vmem:[%s1268_s27 + $0x10] sm:$0xff] %v763_v21 }
 0x316   : > { %772 = vst [vmem:[%s1268_s27 + $0x18] sm:$0xff] %v764_v22 }
 0x31a   : > { %v726_v29 = vpop.f32.mrf.mxu0  ;;  %v755_v30 = vpop.f32.mrf.mxu1 }
 0x31b   : > { %v765_v31 = vadd.f32 %v726_v29, %v619_v27  ;;  %v766_v32 = vadd.f32 %v755_v30, %v620_v28 }
 0x31d   : > { %773 = vst [vmem:[%s1268_s27 + $0x20] sm:$0xff] %v765_v31 }
 0x31e   : > { %774 = vst [vmem:[%s1268_s27 + $0x28] sm:$0xff] %v766_v32 }
 0x322   : > { %v729_v39 = vpop.f32.mrf.mxu0  ;;  %v758_v40 = vpop.f32.mrf.mxu1 }
 0x323   : > { %v767_v41 = vadd.f32 %v729_v39, %v621_v37  ;;  %v768_v42 = vadd.f32 %v758_v40, %v622_v38 }
 0x325   : > { %775 = vst [vmem:[%s1268_s27 + $0x30] sm:$0xff] %v767_v41 }
 0x326   : > { %776 = vst [vmem:[%s1268_s27 + $0x38] sm:$0xff] %v768_v42 }
 0x327 PF: > { %s15_s18 = sadd.s32 1, %s939_s18  }
 0x328   : > { %p12_p4 = scmp.ge.s32.totalorder %s15_s18, 4  }
 0x32a   :  { %14 = sbr.rel (!%p12_p4) target bundleno = 1 (0x1), region = 74 }

</bundles_post_ra>
